<compile_context>
chip_gen: v6e
topology: v6e:2x2x1
jax: 0.10.0
libtpu: 0.0.40
codegen_flags: <defaults>
</compile_context>

<pallas_src>
import jax
import jax.numpy as jnp
from jax.experimental import pallas as pl
from jax.experimental.pallas import tpu as pltpu


# --------------------------------------------------------------------------- #
# Kernels
# --------------------------------------------------------------------------- #
def _pool_gate_kernel(x_ref, w1_ref, s1_ref, w2t_ref, s2_ref, w3_ref, s3_ref,
                      gate_ref, psum_ref):
    """Pass 1: conv1+BN1+LeakyReLU (not stored) -> fused global pool -> gate.

    x_ref:    (Cin, tm)    activation tile, H*W on the lane axis (lane dense)
    w1_ref:   (Cout, Cin)  conv1 weight with BN1 scale folded in
    s1_ref:   (Cout, 1)    BN1 shift
    w2t_ref:  (Cout, Cout) conv2 weight, BN2 scale and 1/(H*W) folded, TRANSPOSED
    s2_ref:   (1, Cout)    BN2 shift (row)
    w3_ref:   (Cout, Cout) conv3 weight with BN3 scale folded
    s3_ref:   (Cout, 1)    BN3 shift (col)
    gate_ref: (Cout, 1)    sigmoid gate output (written only at the last tile)
    psum_ref: (Cout, 128)  VPU partial-sum accumulator (VMEM scratch, resident
                           across the H*W grid axis -> "arbitrary")
    """
    y = jnp.dot(w1_ref[...], x_ref[...], preferred_element_type=jnp.float32)
    y = y + s1_ref[...]
    y = jnp.where(y >= 0.0, y, 0.01 * y)                 # LeakyReLU(0.01)

    @pl.when(pl.program_id(1) == 0)
    def _():
        psum_ref[...] = jnp.zeros_like(psum_ref)

    # Lane-aligned VPU column accumulation (no per-tile cross-lane XLU reduce).
    cw = psum_ref.shape[-1]
    nchunks = y.shape[-1] // cw
    part = y[:, 0:cw]
    for k in range(1, nchunks):
        part = part + y[:, k * cw:(k + 1) * cw]
    psum_ref[...] += part

    @pl.when(pl.program_id(1) == pl.num_programs(1) - 1)
    def _():
        # Single cross-lane reduce per batch sample.
        pooled = jnp.sum(psum_ref[...], axis=-1, keepdims=True)          # (Cout,1)
        # z[i] = sum_j w2f[i,j] * mean[j] + b2[i]  (w2t[j,i] == w2f[i,j]/HW)
        z = jnp.sum(w2t_ref[...] * pooled, axis=0, keepdims=True) + s2_ref[...]
        z = jnp.where(z >= 0.0, z, 0.01 * z)                             # LeakyReLU
        # g[o] = sum_i w3f[o,i] * z[i] + b3[o]
        g = jnp.sum(w3_ref[...] * z, axis=1, keepdims=True) + s3_ref[...]
        gate_ref[...] = 1.0 / (1.0 + jnp.exp(-g))                        # Sigmoid


def _conv_gate_kernel(x_ref, w1_ref, s1_ref, gate_ref, o_ref):
    """Pass 2: recompute conv1+BN1+LeakyReLU and apply the per-sample gate.

    x_ref:    (Cin, tm)   activation tile
    w1_ref:   (Cout, Cin) conv1 weight with BN1 scale folded in
    s1_ref:   (Cout, 1)   BN1 shift
    gate_ref: (Cout, 1)   precomputed sigmoid gate for this batch sample (f32)
    o_ref:    (Cout, tm)  gated output tile (lane dense)
    """
    y = jnp.dot(w1_ref[...], x_ref[...], preferred_element_type=jnp.float32)
    y = y + s1_ref[...]
    y = jnp.where(y >= 0.0, y, 0.01 * y)
    o_ref[...] = (y * gate_ref[...]).astype(o_ref.dtype)


# --------------------------------------------------------------------------- #
# Helpers
# --------------------------------------------------------------------------- #
def _vmem_limit_bytes():
    """Generation-aware VMEM limit (half of capacity, capped at 64 MiB)."""
    try:
        cap = int(pltpu.get_tpu_info().vmem_capacity_bytes)
    except Exception:
        cap = 64 * 1024 * 1024
    return int(min(cap // 2, 64 * 1024 * 1024))


def _pick_hw_tile(hw, cin, cout, in_itemsize, out_itemsize, target, vmem_budget):
    """Largest lane tile (multiple of 128, divides hw, <= target) whose
    double-buffered footprint fits the budget; else fall back to one full-hw
    block (the only other legal shape)."""
    small = 4 * (cout * cin + 2 * cout * cout + 4 * cout + cout * 128)

    def fits(t):
        # Worst case is kernel 2: double-buffered x tile + double-buffered out tile.
        return 2 * (cin * in_itemsize + cout * out_itemsize) * t + small <= vmem_budget

    best = None
    t = 128
    while t <= min(hw, target):
        if hw % t == 0 and fits(t):
            best = t
        t += 128
    if best is not None:
        return best
    # hw not a multiple of 128 (or tiny): a full-extent block is the only legal
    # choice; may exceed the budget only for extreme shapes.
    return hw


# --------------------------------------------------------------------------- #
# Wrapper
# --------------------------------------------------------------------------- #
def weighted_block_forward(x_nchw, w1, bn1, w2, bn2, w3, bn3, eps=1e-5,
                           tm_target=8192, compute_dtype=jnp.bfloat16):
    """Forward pass of WeightedBlock (eval-mode BN).

    x_nchw: (N, Cin, H, W)
    w1: (Cout, Cin, 1, 1)   w2, w3: (Cout, Cout, 1, 1)
    bnX: tuple (gamma, beta, running_mean, running_var), each (Cout,)
    compute_dtype: dtype for the streamed tensors (x, folded conv1 weight);
                   default bf16 halves HBM traffic, accumulation stays f32.
                   Pass jnp.float32 for bit-tight eval semantics.
    """
    N, Cin, H, W = x_nchw.shape
    Cout = w1.shape[0]
    HW = H * W
    f32 = jnp.float32
    compute_dtype = jnp.dtype(compute_dtype)
    out_dtype = x_nchw.dtype

    def _fold(gamma, beta, mean, var):
        s = (gamma / jnp.sqrt(var + eps)).astype(f32)
        b = beta.astype(f32) - mean.astype(f32) * s
        return s, b

    s1, b1 = _fold(*bn1)
    s2, b2 = _fold(*bn2)
    s3, b3 = _fold(*bn3)

    # Fold BN scales into the 1x1-conv weights (exact: (W @ x) * s == (W * s) @ x).
    w1f = w1.reshape(Cout, Cin).astype(f32) * s1[:, None]                # (Cout, Cin)
    shift1 = b1.reshape(Cout, 1)
    # 1/(H*W) of the global average pool folded into conv2; pre-transposed so the
    # in-kernel contraction is a broadcast multiply + sublane reduction.
    w2t = ((w2.reshape(Cout, Cout).astype(f32) * s2[:, None]) / HW).T    # (Cout, Cout)
    shift2 = b2.reshape(1, Cout)
    w3f = w3.reshape(Cout, Cout).astype(f32) * s3[:, None]               # (Cout, Cout)
    shift3 = b3.reshape(Cout, 1)

    # Pure reshape (no transpose, no pad): H*W lands on the lane axis.
    x = x_nchw.reshape(N, Cin, HW).astype(compute_dtype)
    w1c = w1f.astype(compute_dtype)

    in_itemsize = compute_dtype.itemsize
    out_itemsize = jnp.dtype(out_dtype).itemsize
    vmem_limit = _vmem_limit_bytes()
    tm = _pick_hw_tile(HW, Cin, Cout, in_itemsize, out_itemsize,
                       target=tm_target, vmem_budget=(vmem_limit * 3) // 4)
    grid = (N, HW // tm)
    chunk_w = 128 if tm % 128 == 0 else tm

    # ---- Kernel 1: conv1+BN1+LeakyReLU -> fused pool -> squeeze-MLP gate ----
    gate = pl.pallas_call(
        _pool_gate_kernel,
        out_shape=jax.ShapeDtypeStruct((N, Cout, 1), f32),
        grid_spec=pltpu.PrefetchScalarGridSpec(
            num_scalar_prefetch=0,
            grid=grid,
            in_specs=[
                pl.BlockSpec((None, Cin, tm), lambda n, j: (n, 0, j)),   # x tile
                pl.BlockSpec((Cout, Cin), lambda n, j: (0, 0)),          # folded w1
                pl.BlockSpec((Cout, 1), lambda n, j: (0, 0)),            # BN1 shift
                pl.BlockSpec((Cout, Cout), lambda n, j: (0, 0)),         # w2 (folded, T)
                pl.BlockSpec((1, Cout), lambda n, j: (0, 0)),            # BN2 shift
                pl.BlockSpec((Cout, Cout), lambda n, j: (0, 0)),         # w3 (folded)
                pl.BlockSpec((Cout, 1), lambda n, j: (0, 0)),            # BN3 shift
            ],
            out_specs=pl.BlockSpec((None, Cout, 1), lambda n, j: (n, 0, 0)),
            scratch_shapes=[pltpu.VMEM((Cout, chunk_w), f32)],
        ),
        compiler_params=pltpu.CompilerParams(
            dimension_semantics=("parallel", "arbitrary"),
            vmem_limit_bytes=vmem_limit,
        ),
        cost_estimate=pl.CostEstimate(
            flops=2 * N * HW * Cin * Cout + 3 * N * HW * Cout,
            transcendentals=N * Cout,
            bytes_accessed=N * Cin * HW * in_itemsize
                           + (Cout * Cin + 2 * Cout * Cout + 4 * Cout) * 4
                           + N * Cout * 4,
        ),
    )(x, w1c, shift1, w2t, shift2, w3f, shift3)

    # ---- Kernel 2: recompute conv1+BN1+LeakyReLU, apply gate ----
    out = pl.pallas_call(
        _conv_gate_kernel,
        out_shape=jax.ShapeDtypeStruct((N, Cout, HW), out_dtype),
        grid_spec=pltpu.PrefetchScalarGridSpec(
            num_scalar_prefetch=0,
            grid=grid,
            in_specs=[
                pl.BlockSpec((None, Cin, tm), lambda n, j: (n, 0, j)),   # x tile
                pl.BlockSpec((Cout, Cin), lambda n, j: (0, 0)),          # folded w1
                pl.BlockSpec((Cout, 1), lambda n, j: (0, 0)),            # BN1 shift
                pl.BlockSpec((None, Cout, 1), lambda n, j: (n, 0, 0)),   # gate
            ],
            out_specs=pl.BlockSpec((None, Cout, tm), lambda n, j: (n, 0, j)),
        ),
        compiler_params=pltpu.CompilerParams(
            dimension_semantics=("parallel", "parallel"),
            vmem_limit_bytes=vmem_limit,
        ),
        cost_estimate=pl.CostEstimate(
            flops=2 * N * HW * Cin * Cout + 3 * N * HW * Cout,
            transcendentals=0,
            bytes_accessed=N * Cin * HW * in_itemsize
                           + N * Cout * HW * out_itemsize
                           + (Cout * Cin + Cout) * 4 + N * Cout * 4,
        ),
    )(x, w1c, shift1, gate)

    return out.reshape(N, Cout, H, W)


# --------------------------------------------------------------------------- #
# Plain-JAX reference (eval-mode BN) for correctness checking
# --------------------------------------------------------------------------- #
def _reference(x, w1, bn1, w2, bn2, w3, bn3, eps=1e-5):
    def bn(y, p):
        g, b, m, v = p
        s = g / jnp.sqrt(v + eps)
        return (y - m[None, :, None]) * s[None, :, None] + b[None, :, None]

    def lrelu(y):
        return jnp.where(y >= 0, y, 0.01 * y)

    N, Cin, H, W = x.shape
    Cout = w1.shape[0]
    xf = x.reshape(N, Cin, H * W).astype(jnp.float32)
    y1 = lrelu(bn(jnp.einsum("oc,ncm->nom", w1.reshape(Cout, Cin), xf), bn1))
    pooled = jnp.mean(y1, axis=-1, keepdims=True)                         # (N,Cout,1)
    z = lrelu(bn(jnp.einsum("oc,ncm->nom", w2.reshape(Cout, Cout), pooled), bn2))
    gate = jax.nn.sigmoid(bn(jnp.einsum("oc,ncm->nom", w3.reshape(Cout, Cout), z), bn3))
    return (y1 * gate).reshape(N, Cout, H, W)


# --------------------------------------------------------------------------- #
# Self-contained test
# --------------------------------------------------------------------------- #
if __name__ == "__main__":
    key = jax.random.PRNGKey(0)
    keys = jax.random.split(key, 8)

    N, Cin, Cout, H, W = 2, 4, 8, 16, 16

    x = jax.random.normal(keys[0], (N, Cin, H, W), dtype=jnp.float32)
    w1 = 0.3 * jax.random.normal(keys[1], (Cout, Cin, 1, 1), dtype=jnp.float32)
    w2 = 0.3 * jax.random.normal(keys[2], (Cout, Cout, 1, 1), dtype=jnp.float32)
    w3 = 0.3 * jax.random.normal(keys[3], (Cout, Cout, 1, 1), dtype=jnp.float32)

    def bn_params(k):
        kg, kb, km, kv = jax.random.split(k, 4)
        gamma = 1.0 + 0.1 * jax.random.normal(kg, (Cout,), dtype=jnp.float32)
        beta = 0.1 * jax.random.normal(kb, (Cout,), dtype=jnp.float32)
        mean = 0.1 * jax.random.normal(km, (Cout,), dtype=jnp.float32)
        var = jnp.abs(jax.random.normal(kv, (Cout,), dtype=jnp.float32)) + 0.5
        return gamma, beta, mean, var

    bn1, bn2, bn3 = bn_params(keys[4]), bn_params(keys[5]), bn_params(keys[6])

    ref = _reference(x, w1, bn1, w2, bn2, w3, bn3)

    # f32 path (exact eval semantics, tight tolerance), single spatial tile.
    out = weighted_block_forward(x, w1, bn1, w2, bn2, w3, bn3,
                                 compute_dtype=jnp.float32)
    out = jax.block_until_ready(out)
    assert out.shape == (N, Cout, H, W)
    assert jnp.allclose(out, ref, atol=1e-5, rtol=1e-5)

    # f32 path with small tiles to exercise the resident psum accumulator
    # across multiple spatial grid steps.
    out_tiled = weighted_block_forward(x, w1, bn1, w2, bn2, w3, bn3,
                                       tm_target=128, compute_dtype=jnp.float32)
    out_tiled = jax.block_until_ready(out_tiled)
    assert jnp.allclose(out_tiled, ref, atol=1e-5, rtol=1e-5)

    # Default (bf16-streamed) perf path, looser tolerance.
    out_bf16 = weighted_block_forward(x, w1, bn1, w2, bn2, w3, bn3)
    out_bf16 = jax.block_until_ready(out_bf16)
    assert jnp.allclose(out_bf16, ref, atol=5e-2, rtol=5e-2)

    print("KERNEL_OK")
</pallas_src>

<mosaic_0001>
module attributes {stable_mosaic.version = 11 : i64} {
  func.func @_pool_gate_kernel(%arg0: i32, %arg1: i32, %arg2: memref<1x4x256xf32, #tpu.memory_space<vmem>>, %arg3: memref<8x4xf32, #tpu.memory_space<vmem>>, %arg4: memref<8x1xf32, #tpu.memory_space<vmem>>, %arg5: memref<8x8xf32, #tpu.memory_space<vmem>>, %arg6: memref<1x8xf32, #tpu.memory_space<vmem>>, %arg7: memref<8x8xf32, #tpu.memory_space<vmem>>, %arg8: memref<8x1xf32, #tpu.memory_space<vmem>>, %arg9: memref<1x8x1xf32, #tpu.memory_space<vmem>>, %arg10: memref<8x128xf32, #tpu.memory_space<vmem>>) attributes {dimension_semantics = [#tpu.dimension_semantics<parallel>, #tpu.dimension_semantics<arbitrary>], iteration_bounds = array<i64: 2, 1>, scalar_prefetch = 0 : i64, scratch_operands = 1 : i64, tpu.core_type = #tpu.core_type<tc>, window_params = [{transform_indices = @transform_0, window_bounds = array<i64: 1, 4, 256>}, {pipeline_mode = #tpu.pipeline_mode<synchronous>, transform_indices = @transform_1, window_bounds = array<i64: 8, 4>}, {pipeline_mode = #tpu.pipeline_mode<synchronous>, transform_indices = @transform_2, window_bounds = array<i64: 8, 1>}, {pipeline_mode = #tpu.pipeline_mode<synchronous>, transform_indices = @transform_3, window_bounds = array<i64: 8, 8>}, {pipeline_mode = #tpu.pipeline_mode<synchronous>, transform_indices = @transform_4, window_bounds = array<i64: 1, 8>}, {pipeline_mode = #tpu.pipeline_mode<synchronous>, transform_indices = @transform_5, window_bounds = array<i64: 8, 8>}, {pipeline_mode = #tpu.pipeline_mode<synchronous>, transform_indices = @transform_6, window_bounds = array<i64: 8, 1>}, {transform_indices = @transform_7, window_bounds = array<i64: 1, 8, 1>}]} {
    %c0 = arith.constant 0 : index
    %c0_0 = arith.constant 0 : index
    %0 = vector.load %arg3[%c0, %c0_0] : memref<8x4xf32, #tpu.memory_space<vmem>>, vector<8x4xf32>
    %c0_1 = arith.constant 0 : index
    %c0_2 = arith.constant 0 : index
    %c0_3 = arith.constant 0 : index
    %1 = vector.load %arg2[%c0_1, %c0_2, %c0_3] : memref<1x4x256xf32, #tpu.memory_space<vmem>>, vector<1x4x256xf32>
    %2 = vector.shape_cast %1 : vector<1x4x256xf32> to vector<4x256xf32>
    %cst = arith.constant dense<0.000000e+00> : vector<8x256xf32>
    %3 = tpu.matmul %0, %2, %cst {dimension_numbers = #tpu.dot_dimension_numbers<[1], [0], [0], [1], [0, 0, 1, 1], [], []>} : vector<8x4xf32>, vector<4x256xf32>, vector<8x256xf32> -> vector<8x256xf32>
    %c0_4 = arith.constant 0 : index
    %c0_5 = arith.constant 0 : index
    %4 = vector.load %arg4[%c0_4, %c0_5] : memref<8x1xf32, #tpu.memory_space<vmem>>, vector<8x1xf32>
    %5 = vector.broadcast %4 : vector<8x1xf32> to vector<8x256xf32>
    %6 = arith.addf %3, %5 : vector<8x256xf32>
    %cst_6 = arith.constant 0.000000e+00 : f32
    %7 = vector.broadcast %cst_6 : f32 to vector<8x256xf32>
    %8 = arith.cmpf oge, %6, %7 : vector<8x256xf32>
    %cst_7 = arith.constant 0.00999999977 : f32
    %9 = vector.broadcast %cst_7 : f32 to vector<8x256xf32>
    %10 = arith.mulf %9, %6 : vector<8x256xf32>
    %11 = arith.select %8, %6, %10 : vector<8x256xi1>, vector<8x256xf32>
    %c0_i32 = arith.constant 0 : i32
    %12 = arith.cmpi eq, %arg1, %c0_i32 : i32
    %13 = arith.extui %12 : i1 to i32
    %c0_i32_8 = arith.constant 0 : i32
    %14 = arith.cmpi ne, %13, %c0_i32_8 : i32
    scf.if %14 {
      %cst_15 = arith.constant 0.000000e+00 : f32
      %24 = vector.broadcast %cst_15 : f32 to vector<8x128xf32>
      %c0_16 = arith.constant 0 : index
      %c0_17 = arith.constant 0 : index
      %25 = vector.load %arg10[%c0_16, %c0_17] : memref<8x128xf32, #tpu.memory_space<vmem>>, vector<8x128xf32>
      tpu.vector_store %arg10[%c0_16, %c0_17], %24 {strides = array<i32>} : memref<8x128xf32, #tpu.memory_space<vmem>>, vector<8x128xf32>,
    } else {
    }
    %15 = vector.extract_strided_slice %11 {offsets = [0, 0], sizes = [8, 128], strides = [1, 1]} : vector<8x256xf32> to vector<8x128xf32>
    %16 = vector.extract_strided_slice %11 {offsets = [0, 128], sizes = [8, 128], strides = [1, 1]} : vector<8x256xf32> to vector<8x128xf32>
    %17 = arith.addf %15, %16 : vector<8x128xf32>
    %c0_9 = arith.constant 0 : index
    %c0_10 = arith.constant 0 : index
    %18 = vector.load %arg10[%c0_9, %c0_10] : memref<8x128xf32, #tpu.memory_space<vmem>>, vector<8x128xf32>
    %19 = arith.addf %18, %17 : vector<8x128xf32>
    %c0_11 = arith.constant 0 : index
    %c0_12 = arith.constant 0 : index
    %20 = vector.load %arg10[%c0_11, %c0_12] : memref<8x128xf32, #tpu.memory_space<vmem>>, vector<8x128xf32>
    tpu.vector_store %arg10[%c0_11, %c0_12], %19 {strides = array<i32>} : memref<8x128xf32, #tpu.memory_space<vmem>>, vector<8x128xf32>,
    %c0_i32_13 = arith.constant 0 : i32
    %21 = arith.cmpi eq, %arg1, %c0_i32_13 : i32
    %22 = arith.extui %21 : i1 to i32
    %c0_i32_14 = arith.constant 0 : i32
    %23 = arith.cmpi ne, %22, %c0_i32_14 : i32
    scf.if %23 {
      %c0_15 = arith.constant 0 : index
      %c0_16 = arith.constant 0 : index
      %24 = vector.load %arg10[%c0_15, %c0_16] : memref<8x128xf32, #tpu.memory_space<vmem>>, vector<8x128xf32>
      %cst_17 = arith.constant dense<0.000000e+00> : vector<8xf32>
      %25 = vector.multi_reduction <add>, %24, %cst_17 [1] : vector<8x128xf32> to vector<8xf32>
      %26 = vector.shape_cast %25 : vector<8xf32> to vector<8x1xf32>
      %c0_18 = arith.constant 0 : index
      %c0_19 = arith.constant 0 : index
      %27 = vector.load %arg5[%c0_18, %c0_19] : memref<8x8xf32, #tpu.memory_space<vmem>>, vector<8x8xf32>
      %28 = vector.broadcast %26 : vector<8x1xf32> to vector<8x8xf32>
      %29 = arith.mulf %27, %28 : vector<8x8xf32>
      %cst_20 = arith.constant dense<0.000000e+00> : vector<8xf32>
      %30 = vector.multi_reduction <add>, %29, %cst_20 [0] : vector<8x8xf32> to vector<8xf32>
      %31 = vector.shape_cast %30 : vector<8xf32> to vector<1x8xf32>
      %c0_21 = arith.constant 0 : index
      %c0_22 = arith.constant 0 : index
      %32 = vector.load %arg6[%c0_21, %c0_22] : memref<1x8xf32, #tpu.memory_space<vmem>>, vector<1x8xf32>
      %33 = arith.addf %31, %32 : vector<1x8xf32>
      %cst_23 = arith.constant 0.000000e+00 : f32
      %34 = vector.broadcast %cst_23 : f32 to vector<1x8xf32>
      %35 = arith.cmpf oge, %33, %34 : vector<1x8xf32>
      %cst_24 = arith.constant 0.00999999977 : f32
      %36 = vector.broadcast %cst_24 : f32 to vector<1x8xf32>
      %37 = arith.mulf %36, %33 : vector<1x8xf32>
      %38 = arith.select %35, %33, %37 : vector<1x8xi1>, vector<1x8xf32>
      %c0_25 = arith.constant 0 : index
      %c0_26 = arith.constant 0 : index
      %39 = vector.load %arg7[%c0_25, %c0_26] : memref<8x8xf32, #tpu.memory_space<vmem>>, vector<8x8xf32>
      %40 = vector.broadcast %38 : vector<1x8xf32> to vector<8x8xf32>
      %41 = arith.mulf %39, %40 : vector<8x8xf32>
      %cst_27 = arith.constant dense<0.000000e+00> : vector<8xf32>
      %42 = vector.multi_reduction <add>, %41, %cst_27 [1] : vector<8x8xf32> to vector<8xf32>
      %43 = vector.shape_cast %42 : vector<8xf32> to vector<8x1xf32>
      %c0_28 = arith.constant 0 : index
      %c0_29 = arith.constant 0 : index
      %44 = vector.load %arg8[%c0_28, %c0_29] : memref<8x1xf32, #tpu.memory_space<vmem>>, vector<8x1xf32>
      %45 = arith.addf %43, %44 : vector<8x1xf32>
      %cst_30 = arith.constant 0.000000e+00 : f32
      %46 = vector.broadcast %cst_30 : f32 to vector<8x1xf32>
      %47 = arith.subf %46, %45 : vector<8x1xf32>
      %48 = math.exp %47 : vector<8x1xf32>
      %cst_31 = arith.constant 1.000000e+00 : f32
      %49 = vector.broadcast %cst_31 : f32 to vector<8x1xf32>
      %50 = arith.addf %49, %48 : vector<8x1xf32>
      %cst_32 = arith.constant 1.000000e+00 : f32
      %51 = vector.broadcast %cst_32 : f32 to vector<8x1xf32>
      %52 = arith.divf %51, %50 : vector<8x1xf32>
      %c0_33 = arith.constant 0 : index
      %c0_34 = arith.constant 0 : index
      %c0_35 = arith.constant 0 : index
      %53 = vector.load %arg9[%c0_33, %c0_34, %c0_35] : memref<1x8x1xf32, #tpu.memory_space<vmem>>, vector<1x8x1xf32>
      %54 = vector.shape_cast %53 : vector<1x8x1xf32> to vector<8x1xf32>
      %55 = vector.shape_cast %52 : vector<8x1xf32> to vector<1x8x1xf32>
      tpu.vector_store %arg9[%c0_33, %c0_34, %c0_35], %55 {strides = array<i32>} : memref<1x8x1xf32, #tpu.memory_space<vmem>>, vector<1x8x1xf32>,
    } else {
    }
    return
  }
  func.func @transform_0(%arg0: i32, %arg1: i32) -> (i32, i32, i32) {
    %c0_i32 = arith.constant 0 : i32
    %c0_i32_0 = arith.constant 0 : i32
    return %arg0, %c0_i32, %arg1 : i32, i32, i32
  }
  func.func @transform_1(%arg0: i32, %arg1: i32) -> (i32, i32) {
    %c0_i32 = arith.constant 0 : i32
    %c0_i32_0 = arith.constant 0 : i32
    %c0_i32_1 = arith.constant 0 : i32
    return %c0_i32, %c0_i32_0 : i32, i32
  }
  func.func @transform_2(%arg0: i32, %arg1: i32) -> (i32, i32) {
    %c0_i32 = arith.constant 0 : i32
    %c0_i32_0 = arith.constant 0 : i32
    %c0_i32_1 = arith.constant 0 : i32
    return %c0_i32, %c0_i32_0 : i32, i32
  }
  func.func @transform_3(%arg0: i32, %arg1: i32) -> (i32, i32) {
    %c0_i32 = arith.constant 0 : i32
    %c0_i32_0 = arith.constant 0 : i32
    %c0_i32_1 = arith.constant 0 : i32
    return %c0_i32, %c0_i32_0 : i32, i32
  }
  func.func @transform_4(%arg0: i32, %arg1: i32) -> (i32, i32) {
    %c0_i32 = arith.constant 0 : i32
    %c0_i32_0 = arith.constant 0 : i32
    %c0_i32_1 = arith.constant 0 : i32
    return %c0_i32, %c0_i32_0 : i32, i32
  }
  func.func @transform_5(%arg0: i32, %arg1: i32) -> (i32, i32) {
    %c0_i32 = arith.constant 0 : i32
    %c0_i32_0 = arith.constant 0 : i32
    %c0_i32_1 = arith.constant 0 : i32
    return %c0_i32, %c0_i32_0 : i32, i32
  }
  func.func @transform_6(%arg0: i32, %arg1: i32) -> (i32, i32) {
    %c0_i32 = arith.constant 0 : i32
    %c0_i32_0 = arith.constant 0 : i32
    %c0_i32_1 = arith.constant 0 : i32
    return %c0_i32, %c0_i32_0 : i32, i32
  }
  func.func @transform_7(%arg0: i32, %arg1: i32) -> (i32, i32, i32) {
    %c0_i32 = arith.constant 0 : i32
    %c0_i32_0 = arith.constant 0 : i32
    %c0_i32_1 = arith.constant 0 : i32
    return %arg0, %c0_i32, %c0_i32_0 : i32, i32, i32
  }
}

</mosaic_0001>

<bundles_post_ra>
// kernel: tpu_custom_call.1
= control target key start
LH: loop header
LB: loop body
LE: loop exit
PB: predicated region body
PF: predicated region fallthrough
CT: control target
= control target key end

     0   :  { %s629_s24 = smov 0   ;;  %s631_s25 = smov 0   ;;  %s689_s0 = inlined_call_operand.vmem [shape: f32[2,4,256], index: 0, kind: input, shape index: {}]   ;;  %s690_s1 = inlined_call_operand.vmem [shape: f32[8,4], index: 1, kind: input, shape index: {}]   ;;  %s691_s2 = inlined_call_operand.vmem [shape: f32[8,1], index: 2, kind: input, shape index: {}]   ;;  %s692_s3 = inlined_call_operand.vmem [shape: f32[8,8], index: 3, kind: input, shape index: {}]   ;;  %s693_s4 = inlined_call_operand.vmem [shape: f32[1,8], index: 4, kind: input, shape index: {}]   ;;  %s694_s5 = inlined_call_operand.vmem [shape: f32[8,8], index: 5, kind: input, shape index: {}]   ;;  %s695_s6 = inlined_call_operand.vmem [shape: f32[8,1], index: 6, kind: input, shape index: {}]   ;;  %s696_s7 = inlined_call_operand.vmem [shape: f32[2,8,1], index: 7, kind: output, shape index: {}]  }
   0x1   :  { %s633_s26 = smov 0  }
   0x2 LB: > { %s29_s27 = sadd.s32 1, %s581_s25  ;;  %p521_p0 = scmp.ge.s32.totalorder %s585_s26, 1  ;;  %s585_s26 = sphi %s633_s26, %s17_s26   ;;  %s581_s25 = sphi %s631_s25, %s698_s25   ;;  %s577_s24 = sphi %s629_s24, %s697_s24  }
   0x3   : > { %p31_p1 = scmp.ge.s32.totalorder %s29_s27, 2  ;;  %p256_p2 = scmp.lt.s32.totalorder %s585_s26, 3 }
   0x5   : > { %s700_s27 = smov (%p31_p1, %s29_s27), 0  ;;  %p257_p3 = pnand %p521_p0, %p256_p2 }
   0x6   : > { %p292_p4 = scmp.lt.s32.totalorder (!%p257_p3), %s577_s24, 1 }
   0x7   : > { %260 = sbr.rel (%p257_p3) target bundleno = 560 (0x230), region = 48 }
   0xc   : > { %v587_v0 = vmov 0.0   ;;  %v588_v1 = vmov 0   ;;  %v307_v2 = vld [vmem:[%s691_s2] sm:$0xff]  ;;  %s702_s24 = smov (!%p292_p4, %s577_s24), 1  ;;  %vm319_vm0 = vcmask 1043456   ;;  %vm315_vm1 = vcmask 31744  }
   0xd   : > { %388 = vmatprep.mubr.f32.mxu0 %v587_v0  ;;  %557 = vset.pattern.permute.xlu0 %v588_v1  ;;  %s530_s30 = sshll.u32 %s702_s24, 3  ;;  %v305_v5 = vld [vmem:[%s690_s1] sm:$0xff]  ;;  %vm418_vm4 = vcmask 64512   ;;  %v432_v23 = vlaneseq  ;;  %vm448_vm6 = vcmask 7168  }
   0xe   : > { %310 = vperm.xlu0 %557, %v307_v2   ;;  %s299_s10 = scalar_lea.vmem %s689_s0, %s530_s30  ;;  %v416_v16 = vld [vmem:[%s692_s3] sm:$0xff]  ;;  %s304_s23 = scalar_lea.vmem %s696_s7, %s530_s30 }
   0xf   : > { %v306_v3 = vld [vmem:[%s299_s10] sm:$0xff]  ;;  %v433_v27 = vshrl.u32 %v432_v23, 7 }
  0x10   : > { %v314_v4 = vcombine.high %v306_v3, %v306_v3  ;;  %v426_v26 = vld [vmem:[%s693_s4] sm:$0x1] }
  0x11   : > { %v434_v30 = vsub.s32 0, %v433_v27  ;;  %v431_v33 = vld [vmem:[%s694_s5] sm:$0xff] }
  0x12   : > { %525 = vmatprep.subr.msk.mxu0 %vm319_vm0, %v314_v4  ;;  %v440_v37 = vld [vmem:[%s695_s6] sm:$0xff] }
  0x13   : > { %526 = vmatpush1.msk.msra.mxu0 %vm319_vm0, %v306_v3 }
  0x14   : > { %527 = vmatmul.mubr.msk.f32.vlgmr.msra.gmra.mxu0 %vm315_vm1, %v305_v5 }
  0x89   : > { %v311_v6 = vpop.permute.xlu0 %310 }
  0xd4   : > { %v390_v7 = vpop.f32.mrf.mxu0 }
  0xd5   : > { %v391_v8 = vadd.f32 %v390_v7, %v311_v6 }
  0xd6   : > { %v392_v9 = vpop.f32.mrf.mxu0 }
  0xd7   : > { %v397_v10 = vmul.f32 0.01, %v391_v8  ;;  %v393_v11 = vadd.f32 %v392_v9, %v311_v6  ;;  %vm395_vm2 = vcmp.ge.f32.partialorder %v391_v8, 0.0 }
  0xd9   : > { %v398_v12 = vmul.f32 0.01, %v393_v11  ;;  %vm396_vm3 = vcmp.ge.f32.partialorder %v393_v11, 0.0  ;;  %v399_v13 = vsel %vm395_vm2, %v391_v8, %v397_v10 }
  0xdb   : > { %v400_v14 = vsel %vm396_vm3, %v393_v11, %v398_v12 }
  0xdc   : > { %v406_v15 = vadd.f32 %v400_v14, %v399_v13 }
  0xde   : > { %414 = vadd.xlane.f32.xlu0 %v406_v15 }
 0x167   : > { %v415_v17 = vpop.xlane.xlu0 %414 }
 0x168   : > { %v417_v18 = vmul.f32 %v416_v16, %v415_v17 }
 0x16a   : > { %v419_v19 = vsel %vm418_vm4, %v417_v18, 0.0 }
 0x16b   : > { %v420_v20 = vrot.slane %v419_v19, 4 }
 0x16d   : > { %v421_v21 = vadd.f32 %v420_v20, %v419_v19 }
 0x16f   : > { %v422_v22 = vrot.slane %v421_v21, 2 }
 0x171   : > { %v423_v24 = vadd.f32 %v422_v22, %v421_v21 }
 0x173   : > { %v424_v25 = vrot.slane %v423_v24, 1 }
 0x175   : > { %v425_v28 = vadd.f32 %v424_v25, %v423_v24 }
 0x177   : > { %v427_v29 = vadd.f32 %v426_v26, %v425_v28 }
 0x179   : > { %vm428_vm5 = vcmp.ge.f32.partialorder %v427_v29, 0.0  ;;  %v429_v31 = vmul.f32 0.01, %v427_v29 }
 0x17b   : > { %v430_v32 = vsel %vm428_vm5, %v427_v29, %v429_v31 }
 0x17c   : > { %v435_v34 = vrot.slane %v430_v32, %v434_v30 }
 0x17e   : > { %v436_v35 = vmul.f32 %v435_v34, %v431_v33 }
 0x180   : > { %v437_v36 = vsel %vm418_vm4, %v436_v35, 0.0 }
 0x181   : > { %438 = vadd.xlane.f32.xlu1 %v437_v36 }
 0x20a   : > { %v439_v38 = vpop.xlane.xlu1 %438 }
 0x20b   : > { %v441_v39 = vadd.f32 %v440_v37, %v439_v38 }
 0x20d   : > { %v442_v40 = vsub.f32 0.0, %v441_v39 }
 0x20f   : > { %v443_v41 = vmul.f32 1.442695, %v442_v40 }
 0x211   : > { %559 = vpow2.f32 %v443_v41 }
 0x21e   : > { %v560_v42 = vpop.eup %559 }
 0x21f   : > { %v445_v43 = vadd.f32 1.0, %v560_v42 }
 0x221   : > { %561 = vrcp.f32 %v445_v43 }
 0x22e   : > { %v562_v44 = vpop.eup %561 }
 0x22f   : > { %449 = vst.msk [vmem:[%s304_s23] sm:$0xff] %vm448_vm6, %v562_v44 }
 0x230 PF: > { %s17_s26 = sadd.s32 1, %s585_s26   ;;  %s697_s24 = smov %s581_s25 }
 0x231   : > { %p14_p5 = scmp.ge.s32.totalorder %s17_s26, 4   ;;  %s698_s25 = smov %s700_s27 }
 0x233   :  { %16 = sbr.rel (!%p14_p5) target bundleno = 2 (0x2), region = 86 }

</bundles_post_ra>
